<compile_context>
chip_gen: v5e
topology: v5e:2x2
jax: 0.10.0
libtpu: 0.0.40
codegen_flags: <defaults>
</compile_context>

<pallas_src>
import functools

import jax
import jax.numpy as jnp
import numpy as np
from jax.experimental import pallas as pl
from jax.experimental.pallas import tpu as pltpu


def _round_up(a, b):
    return ((a + b - 1) // b) * b


def _vmem_capacity_bytes():
    try:
        return int(pltpu.get_tpu_info().vmem_capacity_bytes)
    except Exception:
        return 64 << 20  # conservative fallback: v7x per-TensorCore VMEM


def _vmem_footprint(tm, E, Hp, tn):
    """Rough VMEM bytes for one pipeline configuration (with margin)."""
    nj = Hp // tn
    wbuf = 1 if nj == 1 else 2          # streamed weight blocks double-buffer
    return (
        E * Hp * 2                      # W1 (bf16, resident, single buffer)
        + (Hp + E) * 4                  # b1, b3 (f32, resident)
        + wbuf * Hp * tn * 2            # W2 column block(s) (bf16)
        + wbuf * tn * 4                 # b2 block(s)
        + wbuf * tn * E * 2             # W3 row block(s) (bf16)
        + 2 * tm * E * 4                # x tiles (f32, double-buffered)
        + 2 * tm * E * 4                # out tiles (f32, double-buffered)
        + tm * Hp * 2                   # h1 scratch (bf16)
        + 2 * tm * Hp * 4               # live f32 intermediates (estimate)
        + (4 << 20)                     # Mosaic internal scratch margin
    )


def _plan(M, E, Hp, tm_hint, tn_override, cap):
    """Pick (row tile, W2 column tile) that fits the VMEM budget."""
    budget = max(cap - (16 << 20), 16 << 20)
    if tn_override is not None:
        tn_override = int(tn_override)
        assert Hp % tn_override == 0 and tn_override % 128 == 0
        tn_cands = [tn_override]
    else:
        tn_cands = [Hp] + [c for c in range(Hp - 128, 127, -128) if Hp % c == 0]
    if M <= tm_hint:
        tm_cands = [M]                  # single block covering all rows
    else:
        tm_cands, t = [], tm_hint
        while t >= 64:
            tm_cands.append(t)
            t //= 2
    for tm_eff in tm_cands:
        for tn in tn_cands:
            if _vmem_footprint(tm_eff, E, Hp, tn) <= budget:
                return tm_eff, tn
    return tm_cands[-1], tn_cands[-1]   # last resort: smallest tiles


def _ffn_kernel(x_ref, w1_ref, b1_ref, w2_ref, b2_ref, w3_ref, b3_ref,
                o_ref, h1_ref):
    # Grid = (row tiles, W2-column tiles).  For each row tile: at j == 0 compute
    # h1 = relu(x @ W1 + b1) once into a VMEM scratch and seed the resident f32
    # output block with b3; every j then adds relu(h1 @ W2_j + b2_j) @ W3_j.
    j = pl.program_id(1)

    @pl.when(j == 0)
    def _():
        xb = x_ref[...].astype(jnp.bfloat16)        # cast in-kernel (x is f32 in HBM)
        h1 = jnp.dot(xb, w1_ref[...], preferred_element_type=jnp.float32)
        h1 = jnp.maximum(h1 + b1_ref[...], 0.0)
        h1_ref[...] = h1.astype(jnp.bfloat16)
        o_ref[...] = jnp.broadcast_to(b3_ref[...], o_ref.shape).astype(o_ref.dtype)

    h2 = jnp.dot(h1_ref[...], w2_ref[...], preferred_element_type=jnp.float32)
    h2 = jnp.maximum(h2 + b2_ref[...], 0.0).astype(jnp.bfloat16)
    o_ref[...] += jnp.dot(h2, w3_ref[...],
                          preferred_element_type=jnp.float32).astype(o_ref.dtype)


def prepare_ffn_params(params):
    """Pad + cast the FFN weights ONCE (cache the result next to the model).

    params: dict with w1 (E,4E), b1 (4E,), w2 (4E,4E), b2 (4E,), w3 (4E,E), b3 (E,)
    """
    E, H = params["w1"].shape
    Hp = _round_up(H, 256) if H >= 256 else _round_up(H, 128)
    ph = Hp - H
    return dict(
        w1=jnp.pad(params["w1"], ((0, 0), (0, ph))).astype(jnp.bfloat16),
        w2=jnp.pad(params["w2"], ((0, ph), (0, ph))).astype(jnp.bfloat16),
        w3=jnp.pad(params["w3"], ((0, ph), (0, 0))).astype(jnp.bfloat16),
        b1=jnp.pad(params["b1"], (0, ph)).reshape(1, Hp).astype(jnp.float32),
        b2=jnp.pad(params["b2"], (0, ph)).reshape(1, Hp).astype(jnp.float32),
        b3=params["b3"].reshape(1, E).astype(jnp.float32),
    )


@functools.partial(jax.jit, static_argnames=("tm", "tn_override"))
def deep_feed_forward(x, prepared, *, tm=512, tn_override=None):
    """x: (B, T, E) float32.  prepared: output of prepare_ffn_params()."""
    B, T, E = x.shape
    M = B * T
    Hp = prepared["w1"].shape[1]

    cap = _vmem_capacity_bytes()
    tm_hint = max(_round_up(int(tm), 32), 32)      # bf16 sublane tile is 16; use 32
    tm_eff, tn = _plan(M, E, Hp, tm_hint, tn_override, cap)
    nj = Hp // tn
    grid_i = pl.cdiv(M, tm_eff)

    resident = pl.Buffered(1)                       # grid-invariant: single buffer

    def spec(shape, idx, mode=None):
        if mode is None:
            return pl.BlockSpec(shape, idx)
        return pl.BlockSpec(shape, idx, pipeline_mode=mode)

    w2_mode = resident if nj == 1 else None         # stream -> default double-buffer

    in_specs = [
        spec((tm_eff, E), lambda i, j: (i, 0)),               # x rows (pipelined)
        spec((E, Hp),  lambda i, j: (0, 0), resident),        # W1
        spec((1, Hp),  lambda i, j: (0, 0), resident),        # b1
        spec((Hp, tn), lambda i, j: (0, j), w2_mode),         # W2 column block
        spec((1, tn),  lambda i, j: (0, j), w2_mode),         # b2 column block
        spec((tn, E),  lambda i, j: (j, 0), w2_mode),         # W3 row block
        spec((1, E),   lambda i, j: (0, 0), resident),        # b3
    ]
    out_spec = pl.BlockSpec((tm_eff, E), lambda i, j: (i, 0))  # f32 accumulator

    fp = _vmem_footprint(tm_eff, E, Hp, tn)
    vmem_limit = int(min(max(fp + (4 << 20), 32 << 20),
                         max(cap - (12 << 20), 32 << 20)))

    w_bytes = (E * Hp + Hp * Hp + Hp * E) * 2 + (2 * Hp + E) * 4
    cost = pl.CostEstimate(
        flops=2 * M * (E * Hp + Hp * Hp + Hp * E),
        transcendentals=0,
        bytes_accessed=M * E * 8 + w_bytes,
    )

    # Only shard rows across TensorCores (v7x: 2 TCs) when the grid is large
    # enough to pay for duplicating the resident-weight DMA per core.
    row_sem = "parallel" if grid_i >= 4 else "arbitrary"

    out2d = pl.pallas_call(
        _ffn_kernel,
        out_shape=jax.ShapeDtypeStruct((M, E), x.dtype),
        grid_spec=pltpu.PrefetchScalarGridSpec(
            num_scalar_prefetch=0,
            grid=(grid_i, nj),
            in_specs=in_specs,
            out_specs=out_spec,
            scratch_shapes=[pltpu.VMEM((tm_eff, Hp), jnp.bfloat16)],
        ),
        compiler_params=pltpu.CompilerParams(
            dimension_semantics=(row_sem, "arbitrary"),
            vmem_limit_bytes=vmem_limit,
        ),
        cost_estimate=cost,
    )(x.reshape(M, E), prepared["w1"], prepared["b1"], prepared["w2"],
      prepared["b2"], prepared["w3"], prepared["b3"])

    return out2d.reshape(B, T, E)


def init_params(key, embed_size):
    """Deterministic init matching the PyTorch module's Linear shapes.

    PyTorch nn.Linear(in, out) has weight (out, in); we store it transposed as
    (in, out) for the kernel's x @ W convention.
    """
    E, H = embed_size, 4 * embed_size
    ks = jax.random.split(key, 6)

    def lin(kw, kb, fan_in, fan_out):
        bound = 1.0 / np.sqrt(fan_in)
        w = jax.random.uniform(kw, (fan_in, fan_out), jnp.float32, -bound, bound)
        b = jax.random.uniform(kb, (fan_out,), jnp.float32, -bound, bound)
        return w, b

    w1, b1 = lin(ks[0], ks[1], E, H)
    w2, b2 = lin(ks[2], ks[3], H, H)
    w3, b3 = lin(ks[4], ks[5], H, E)
    return dict(w1=w1, b1=b1, w2=w2, b2=b2, w3=w3, b3=b3)


def _reference(x, p):
    # Mirror the kernel's numerics: bf16-rounded matmul operands, f32 math.
    hp = jax.lax.Precision.HIGHEST
    f32 = jnp.float32
    bf = lambda a: a.astype(jnp.bfloat16).astype(f32)
    h1 = jnp.maximum(jnp.dot(bf(x), bf(p["w1"]), precision=hp) + p["b1"], 0.0)
    h2 = jnp.maximum(jnp.dot(bf(h1), bf(p["w2"]), precision=hp) + p["b2"], 0.0)
    return jnp.dot(bf(h2), bf(p["w3"]), precision=hp) + p["b3"]


# TODO(synk): the Generator / Predictor sampling loop (Categorical sampling,
# bincount targets, best-of-M selection) is host-side control flow and is not
# implemented as a Pallas kernel.  For end-to-end speed, batch the M candidate
# sequences into the leading dim of a single deep_feed_forward call.

if __name__ == "__main__":
    key = jax.random.PRNGKey(0)
    kx, kp, kx2, kp2, kx3 = jax.random.split(key, 5)

    # Primary config: batch=2, seq=8, embed=32 (hidden = 128).
    B, T, E = 2, 8, 32
    x = jax.random.normal(kx, (B, T, E), dtype=jnp.float32)
    params = init_params(kp, E)
    prepared = prepare_ffn_params(params)          # one-time pad + bf16 cast

    out = jax.block_until_ready(deep_feed_forward(x, prepared))
    ref = _reference(x, params)
    np.testing.assert_allclose(np.asarray(out), np.asarray(ref), rtol=2e-3, atol=2e-3)

    # Exercise the streamed-W2 fallback path (second grid axis over Hp columns).
    E2 = 64
    x2 = jax.random.normal(kx2, (B, T, E2), dtype=jnp.float32)
    params2 = init_params(kp2, E2)
    prepared2 = prepare_ffn_params(params2)
    out2 = jax.block_until_ready(deep_feed_forward(x2, prepared2, tn_override=128))
    ref2 = _reference(x2, params2)
    np.testing.assert_allclose(np.asarray(out2), np.asarray(ref2), rtol=2e-3, atol=2e-3)

    # Exercise the ragged last row block (M not divisible by the row tile).
    B3, T3 = 3, 50                                  # M = 150, tm = 64 -> ragged tail
    x3 = jax.random.normal(kx3, (B3, T3, E), dtype=jnp.float32)
    out3 = jax.block_until_ready(deep_feed_forward(x3, prepared, tm=64))
    ref3 = _reference(x3, params)
    np.testing.assert_allclose(np.asarray(out3), np.asarray(ref3), rtol=2e-3, atol=2e-3)

    print("KERNEL_OK")
</pallas_src>

<mosaic_0001>
module attributes {stable_mosaic.version = 11 : i64} {
  func.func @_ffn_kernel(%arg0: i32, %arg1: i32, %arg2: memref<16x32xf32, #tpu.memory_space<vmem>>, %arg3: memref<32x128xbf16, #tpu.memory_space<vmem>>, %arg4: memref<1x128xf32, #tpu.memory_space<vmem>>, %arg5: memref<128x128xbf16, #tpu.memory_space<vmem>>, %arg6: memref<1x128xf32, #tpu.memory_space<vmem>>, %arg7: memref<128x32xbf16, #tpu.memory_space<vmem>>, %arg8: memref<1x32xf32, #tpu.memory_space<vmem>>, %arg9: memref<16x32xf32, #tpu.memory_space<vmem>>, %arg10: memref<16x128xbf16, #tpu.memory_space<vmem>>) attributes {dimension_semantics = [#tpu.dimension_semantics<arbitrary>, #tpu.dimension_semantics<arbitrary>], iteration_bounds = array<i64: 1, 1>, scalar_prefetch = 0 : i64, scratch_operands = 1 : i64, tpu.core_type = #tpu.core_type<tc>, window_params = [{transform_indices = @transform_0, window_bounds = array<i64: 16, 32>}, {pipeline_mode = #tpu.pipeline_mode<synchronous>, transform_indices = @transform_1, window_bounds = array<i64: 32, 128>}, {pipeline_mode = #tpu.pipeline_mode<synchronous>, transform_indices = @transform_2, window_bounds = array<i64: 1, 128>}, {pipeline_mode = #tpu.pipeline_mode<synchronous>, transform_indices = @transform_3, window_bounds = array<i64: 128, 128>}, {pipeline_mode = #tpu.pipeline_mode<synchronous>, transform_indices = @transform_4, window_bounds = array<i64: 1, 128>}, {pipeline_mode = #tpu.pipeline_mode<synchronous>, transform_indices = @transform_5, window_bounds = array<i64: 128, 32>}, {pipeline_mode = #tpu.pipeline_mode<synchronous>, transform_indices = @transform_6, window_bounds = array<i64: 1, 32>}, {transform_indices = @transform_7, window_bounds = array<i64: 16, 32>}]} {
    %c0_i32 = arith.constant 0 : i32
    %0 = arith.cmpi eq, %arg1, %c0_i32 : i32
    %1 = arith.extui %0 : i1 to i32
    %c0_i32_0 = arith.constant 0 : i32
    %2 = arith.cmpi ne, %1, %c0_i32_0 : i32
    scf.if %2 {
      %c0_14 = arith.constant 0 : index
      %c0_15 = arith.constant 0 : index
      %17 = vector.load %arg2[%c0_14, %c0_15] : memref<16x32xf32, #tpu.memory_space<vmem>>, vector<16x32xf32>
      %18 = arith.truncf %17 : vector<16x32xf32> to vector<16x32xbf16>
      %c0_16 = arith.constant 0 : index
      %c0_17 = arith.constant 0 : index
      %19 = vector.load %arg3[%c0_16, %c0_17] : memref<32x128xbf16, #tpu.memory_space<vmem>>, vector<32x128xbf16>
      %cst_18 = arith.constant dense<0.000000e+00> : vector<16x128xf32>
      %20 = tpu.matmul %18, %19, %cst_18 {dimension_numbers = #tpu.dot_dimension_numbers<[1], [0], [0], [1], [0, 0, 1, 1], [], []>} : vector<16x32xbf16>, vector<32x128xbf16>, vector<16x128xf32> -> vector<16x128xf32>
      %c0_19 = arith.constant 0 : index
      %c0_20 = arith.constant 0 : index
      %21 = vector.load %arg4[%c0_19, %c0_20] : memref<1x128xf32, #tpu.memory_space<vmem>>, vector<1x128xf32>
      %22 = vector.broadcast %21 : vector<1x128xf32> to vector<16x128xf32>
      %23 = arith.addf %20, %22 : vector<16x128xf32>
      %cst_21 = arith.constant 0.000000e+00 : f32
      %24 = vector.broadcast %cst_21 : f32 to vector<16x128xf32>
      %25 = arith.maximumf %23, %24 : vector<16x128xf32>
      %26 = arith.truncf %25 : vector<16x128xf32> to vector<16x128xbf16>
      %c0_22 = arith.constant 0 : index
      %c0_23 = arith.constant 0 : index
      %27 = vector.load %arg10[%c0_22, %c0_23] : memref<16x128xbf16, #tpu.memory_space<vmem>>, vector<16x128xbf16>
      tpu.vector_store %arg10[%c0_22, %c0_23], %26 {strides = array<i32>} : memref<16x128xbf16, #tpu.memory_space<vmem>>, vector<16x128xbf16>,
      %c0_24 = arith.constant 0 : index
      %c0_25 = arith.constant 0 : index
      %28 = vector.load %arg8[%c0_24, %c0_25] : memref<1x32xf32, #tpu.memory_space<vmem>>, vector<1x32xf32>
      %29 = vector.shape_cast %28 : vector<1x32xf32> to vector<1x32xf32>
      %30 = vector.broadcast %29 : vector<1x32xf32> to vector<16x32xf32>
      %c0_26 = arith.constant 0 : index
      %c0_27 = arith.constant 0 : index
      %31 = vector.load %arg9[%c0_26, %c0_27] : memref<16x32xf32, #tpu.memory_space<vmem>>, vector<16x32xf32>
      tpu.vector_store %arg9[%c0_26, %c0_27], %30 {strides = array<i32>} : memref<16x32xf32, #tpu.memory_space<vmem>>, vector<16x32xf32>,
    } else {
    }
    %c0 = arith.constant 0 : index
    %c0_1 = arith.constant 0 : index
    %3 = vector.load %arg10[%c0, %c0_1] : memref<16x128xbf16, #tpu.memory_space<vmem>>, vector<16x128xbf16>
    %c0_2 = arith.constant 0 : index
    %c0_3 = arith.constant 0 : index
    %4 = vector.load %arg5[%c0_2, %c0_3] : memref<128x128xbf16, #tpu.memory_space<vmem>>, vector<128x128xbf16>
    %cst = arith.constant dense<0.000000e+00> : vector<16x128xf32>
    %5 = tpu.matmul %3, %4, %cst {dimension_numbers = #tpu.dot_dimension_numbers<[1], [0], [0], [1], [0, 0, 1, 1], [], []>} : vector<16x128xbf16>, vector<128x128xbf16>, vector<16x128xf32> -> vector<16x128xf32>
    %c0_4 = arith.constant 0 : index
    %c0_5 = arith.constant 0 : index
    %6 = vector.load %arg6[%c0_4, %c0_5] : memref<1x128xf32, #tpu.memory_space<vmem>>, vector<1x128xf32>
    %7 = vector.broadcast %6 : vector<1x128xf32> to vector<16x128xf32>
    %8 = arith.addf %5, %7 : vector<16x128xf32>
    %cst_6 = arith.constant 0.000000e+00 : f32
    %9 = vector.broadcast %cst_6 : f32 to vector<16x128xf32>
    %10 = arith.maximumf %8, %9 : vector<16x128xf32>
    %11 = arith.truncf %10 : vector<16x128xf32> to vector<16x128xbf16>
    %c0_7 = arith.constant 0 : index
    %c0_8 = arith.constant 0 : index
    %12 = vector.load %arg9[%c0_7, %c0_8] : memref<16x32xf32, #tpu.memory_space<vmem>>, vector<16x32xf32>
    %c0_9 = arith.constant 0 : index
    %c0_10 = arith.constant 0 : index
    %13 = vector.load %arg7[%c0_9, %c0_10] : memref<128x32xbf16, #tpu.memory_space<vmem>>, vector<128x32xbf16>
    %cst_11 = arith.constant dense<0.000000e+00> : vector<16x32xf32>
    %14 = tpu.matmul %11, %13, %cst_11 {dimension_numbers = #tpu.dot_dimension_numbers<[1], [0], [0], [1], [0, 0, 1, 1], [], []>} : vector<16x128xbf16>, vector<128x32xbf16>, vector<16x32xf32> -> vector<16x32xf32>
    %15 = arith.addf %12, %14 : vector<16x32xf32>
    %c0_12 = arith.constant 0 : index
    %c0_13 = arith.constant 0 : index
    %16 = vector.load %arg9[%c0_12, %c0_13] : memref<16x32xf32, #tpu.memory_space<vmem>>, vector<16x32xf32>
    tpu.vector_store %arg9[%c0_12, %c0_13], %15 {strides = array<i32>} : memref<16x32xf32, #tpu.memory_space<vmem>>, vector<16x32xf32>,
    return
  }
  func.func @transform_0(%arg0: i32, %arg1: i32) -> (i32, i32) {
    %c0_i32 = arith.constant 0 : i32
    %c0_i32_0 = arith.constant 0 : i32
    return %arg0, %c0_i32 : i32, i32
  }
  func.func @transform_1(%arg0: i32, %arg1: i32) -> (i32, i32) {
    %c0_i32 = arith.constant 0 : i32
    %c0_i32_0 = arith.constant 0 : i32
    %c0_i32_1 = arith.constant 0 : i32
    return %c0_i32, %c0_i32_0 : i32, i32
  }
  func.func @transform_2(%arg0: i32, %arg1: i32) -> (i32, i32) {
    %c0_i32 = arith.constant 0 : i32
    %c0_i32_0 = arith.constant 0 : i32
    %c0_i32_1 = arith.constant 0 : i32
    return %c0_i32, %c0_i32_0 : i32, i32
  }
  func.func @transform_3(%arg0: i32, %arg1: i32) -> (i32, i32) {
    %c0_i32 = arith.constant 0 : i32
    %c0_i32_0 = arith.constant 0 : i32
    return %c0_i32, %arg1 : i32, i32
  }
  func.func @transform_4(%arg0: i32, %arg1: i32) -> (i32, i32) {
    %c0_i32 = arith.constant 0 : i32
    %c0_i32_0 = arith.constant 0 : i32
    return %c0_i32, %arg1 : i32, i32
  }
  func.func @transform_5(%arg0: i32, %arg1: i32) -> (i32, i32) {
    %c0_i32 = arith.constant 0 : i32
    %c0_i32_0 = arith.constant 0 : i32
    return %arg1, %c0_i32 : i32, i32
  }
  func.func @transform_6(%arg0: i32, %arg1: i32) -> (i32, i32) {
    %c0_i32 = arith.constant 0 : i32
    %c0_i32_0 = arith.constant 0 : i32
    %c0_i32_1 = arith.constant 0 : i32
    return %c0_i32, %c0_i32_0 : i32, i32
  }
  func.func @transform_7(%arg0: i32, %arg1: i32) -> (i32, i32) {
    %c0_i32 = arith.constant 0 : i32
    %c0_i32_0 = arith.constant 0 : i32
    return %arg0, %c0_i32 : i32, i32
  }
}

</mosaic_0001>

<bundles_post_ra>
// kernel: deep_feed_forward.1
= control target key start
LH: loop header
LB: loop body
LE: loop exit
PB: predicated region body
PF: predicated region fallthrough
CT: control target
= control target key end

     0   :  { %12 = vsyncpa [#allocation4], 0  ;;  %s580_s0 = inlined_call_operand.vmem [shape: f32[16,32], index: 0, kind: input, shape index: {}]   ;;  %s581_s1 = inlined_call_operand.hbm [shape: bf16[32,128], index: 1, kind: input, shape index: {}]   ;;  %s582_s2 = inlined_call_operand.vmem [shape: f32[1,128], index: 2, kind: input, shape index: {}]   ;;  %s583_s3 = inlined_call_operand.vmem [shape: bf16[128,128], index: 3, kind: input, shape index: {}]   ;;  %s584_s4 = inlined_call_operand.vmem [shape: f32[1,128], index: 4, kind: input, shape index: {}]   ;;  %s585_s5 = inlined_call_operand.vmem [shape: bf16[128,32], index: 5, kind: input, shape index: {}]   ;;  %s586_s6 = inlined_call_operand.vmem [shape: f32[1,32], index: 6, kind: input, shape index: {}]   ;;  %s587_s7 = inlined_call_operand.hbm [shape: f32[16,32], index: 7, kind: output, shape index: {}]  }
   0x1   :  { %13 = vsyncpa [#allocation5], 0  ;;  %s20_s26 = sshll.u32 %s581_s1, 4  ;;  %s460_s27 = smov [#allocation3]   ;;  %s21_s26 = int_to_ptr.hbm [resolvable:$true] %s20_s26 }
   0x2   :  { %s22_s28 = sshll.u32 %s460_s27, 4  ;;  %s461_s29 = smov 64   ;;  %s23_s28 = int_to_ptr.vmem [resolvable:$true] %s22_s28 }
   0x3   :  { %s462_s30 = smov 4  }
   0x4   :  { %28 = dma.hbm_to_vmem [thread:$0]  %s21_s26, 256, %s23_s28, [#allocation4], %s461_s29, %s461_s29, %s462_s30  }
   0x5   :  { %456 = dma.done.wait [#allocation4], 256  }
   0x6   :  { %457 = vsyncadd [#allocation4], 4294967040  ;;  %v376_v0 = vld [vmem:[#allocation3 + $0x8] sm:$0xff]  ;;  %v375_v1 = vld [vmem:[#allocation3] sm:$0xff]  ;;  %vm71_vm0 = vcmask 261120   ;;  %s463_s19 = smov [#allocation6]  }
   0x7   :  { %v48_v2 = vld [vmem:[%s580_s0] sm:$0xff]  ;;  %81 = vmatpush.bf16.msra.mxu0 %v376_v0  ;;  %v49_v4 = vld [vmem:[%s580_s0 + $0x8] sm:$0xff]  ;;  %v385_v5 = vld [vmem:[%s583_s3 + $0x38] sm:$0xff]  ;;  %s285_s22 = sshll.u32 %s587_s7, 4  ;;  %s465_s23 = smov 8   ;;  %s286_s22 = int_to_ptr.hbm [resolvable:$true] %s285_s22 }
   0x8   :  { %v405_v3 = vld [vmem:[%s586_s6] ss:$0 sm:$0xff]  ;;  %177 = vmatpush.bf16.msra.mxu1 %v385_v5  ;;  %v384_v6 = vld [vmem:[%s583_s3 + $0x30] sm:$0xff]  ;;  %v50_v7 = vpack.c.bf16 %v49_v4, %v48_v2  ;;  %v383_v8 = vld [vmem:[%s583_s3 + $0x28] sm:$0xff] }
   0x9   :  { %99 = vst.msk [vmem:[#allocation6] sm:$0xff] %vm71_vm0, %v405_v3  ;;  %v382_v9 = vld [vmem:[%s583_s3 + $0x20] sm:$0xff]  ;;  %v381_v10 = vld [vmem:[%s583_s3 + $0x18] sm:$0xff]  ;;  %v380_v11 = vld [vmem:[%s583_s3 + $0x10] sm:$0xff] }
   0xa   :  { %100 = vst.msk [vmem:[#allocation6 + $0x8] sm:$0xff] %vm71_vm0, %v405_v3  ;;  %v379_v12 = vld [vmem:[%s583_s3 + $0x8] sm:$0xff]  ;;  %v378_v13 = vld [vmem:[%s583_s3] sm:$0xff]  ;;  %v393_v14 = vld [vmem:[%s585_s5 + $0x38] sm:$0xff] }
   0xb   :  { %82 = vmatpush.bf16.msra.mxu0 %v375_v1  ;;  %260 = vmatpush.bf16.msra.mxu2 %v393_v14  ;;  %v392_v15 = vld [vmem:[%s585_s5 + $0x30] sm:$0xff]  ;;  %v391_v16 = vld [vmem:[%s585_s5 + $0x28] sm:$0xff]  ;;  %v390_v18 = vld [vmem:[%s585_s5 + $0x20] sm:$0xff] }
   0xc   :  { %178 = vmatpush.bf16.msra.mxu1 %v384_v6  ;;  %v406_v19 = vld [vmem:[%s582_s2] ss:$0 sm:$0xff]  ;;  %v389_v27 = vld [vmem:[%s585_s5 + $0x18] sm:$0xff]  ;;  %v388_v28 = vld [vmem:[%s585_s5 + $0x10] sm:$0xff] }
   0xd   :  { %v387_v29 = vld [vmem:[%s585_s5 + $0x8] sm:$0xff]  ;;  %v386_v30 = vld [vmem:[%s585_s5] sm:$0xff]  ;;  %s283_s5 = sshll.u32 %s463_s19, 4  ;;  %s284_s5 = int_to_ptr.vmem [resolvable:$true] %s283_s5 }
   0xe   :  { %306 = vmatmul.msk.bf16.vlgmr.msra.gmra.mxu0 %vm71_vm0, %v50_v7  ;;  %v407_v32 = vld [vmem:[%s584_s4] ss:$0 sm:$0xff]  ;;  %s464_s4 = smov 128  }
   0xf   :  { %261 = vmatpush.bf16.msra.mxu2 %v392_v15 }
  0x10   :  { %179 = vmatpush.bf16.msra.mxu1 %v383_v8  ;;  %v194_v39 = vld [vmem:[#allocation6] sm:$0xff] }
  0x11   :  { %v195_v42 = vld [vmem:[#allocation6 + $0x8] sm:$0xff] }
  0x13   :  { %262 = vmatpush.bf16.msra.mxu2 %v391_v16 }
  0x14   :  { %180 = vmatpush.bf16.msra.mxu1 %v382_v9 }
  0x17   :  { %263 = vmatpush.bf16.msra.mxu2 %v390_v18 }
  0x18   :  { %181 = vmatpush.bf16.msra.mxu1 %v381_v10 }
  0x1b   :  { %264 = vmatpush.bf16.msra.mxu2 %v389_v27 }
  0x1c   :  { %182 = vmatpush.bf16.msra.mxu1 %v380_v11 }
  0x1f   :  { %265 = vmatpush.bf16.msra.mxu2 %v388_v28 }
  0x20   :  { %183 = vmatpush.bf16.msra.mxu1 %v379_v12 }
  0x23   :  { %266 = vmatpush.bf16.msra.mxu2 %v387_v29 }
  0x24   :  { %184 = vmatpush.bf16.msra.mxu1 %v378_v13 }
  0x27   :  { %267 = vmatpush.bf16.msra.mxu2 %v386_v30 }
  0x8b   :  { %v84_v17 = vpop.f32.mrf.mxu0 }
  0x8c   :  { %v85_v20 = vadd.f32 %v406_v19, %v84_v17 }
  0x8e   :  { %v89_v23 = vmax.f32 %v85_v20, 0.0 }
  0x93   :  { %v86_v21 = vpop.f32.mrf.mxu0 }
  0x94   :  { %v87_v22 = vadd.f32 %v406_v19, %v86_v21 }
  0x96   :  { %v90_v24 = vmax.f32 %v87_v22, 0.0 }
  0x98   :  { %v397_v25 = vpack.c.bf16 %v90_v24, %v89_v23 }
  0x9a   :  { %398 = vst [vmem:[#allocation2] sm:$0xff] %v397_v25  }
  0xa1   :  { %v377_v26 = vld [vmem:[#allocation2] sm:$0xff] }
  0xa2   :  { %185 = vmatmul.bf16.vlgmr.msra.gmra.mxu1 %v377_v26 }
 0x11f   :  { %v186_v31 = vpop.f32.mrf.mxu1 }
 0x120   :  { %v187_v33 = vadd.f32 %v407_v32, %v186_v31 }
 0x122   :  { %v191_v36 = vmax.f32 %v187_v33, 0.0 }
 0x127   :  { %v188_v34 = vpop.f32.mrf.mxu1 }
 0x128   :  { %v189_v35 = vadd.f32 %v407_v32, %v188_v34 }
 0x12a   :  { %v192_v37 = vmax.f32 %v189_v35, 0.0 }
 0x12c   :  { %v193_v38 = vpack.c.bf16 %v192_v37, %v191_v36 }
 0x12e   :  { %268 = vmatmul.bf16.vlgmr.msra.gmra.mxu2 %v193_v38 }
 0x1b1   :  { %v269_v40 = vpop.f32.mrf.mxu2 }
 0x1b2   :  { %v274_v41 = vadd.f32 %v269_v40, %v194_v39 }
 0x1b4   :  { %277 = vst.msk [vmem:[#allocation6] sm:$0xff] %vm71_vm0, %v274_v41 }
 0x1b9   :  { %v271_v43 = vpop.f32.mrf.mxu2 }
 0x1ba   :  { %v275_v44 = vadd.f32 %v271_v43, %v195_v42 }
 0x1bc   :  { %278 = vst.msk [vmem:[#allocation6 + $0x8] sm:$0xff] %vm71_vm0, %v275_v44 }
 0x1bd   :  { %291 = dma.vmem_to_hbm [thread:$0]  %s284_s5, 256, %s286_s22, [#allocation5], %s464_s4, %s464_s4, %s465_s23  }
 0x1be   :  { %458 = dma.done.wait [#allocation5], 256  }
 0x1bf   :  { %459 = vsyncadd [#allocation5], 4294967040 }
 0x1c0   :  { %296 = vsyncpa [#allocation4], 1 }
 0x1c1   :  { %297 = vsyncpa [#allocation5], 1 }

</bundles_post_ra>
